<compile_context>
chip_gen: v7x
topology: tpu7x:2x2x1
jax: 0.10.0
libtpu: 0.0.40
codegen_flags: <defaults>
</compile_context>

<pallas_src>
import functools

import jax
import jax.numpy as jnp
from jax.experimental import pallas as pl
from jax.experimental.pallas import tpu as pltpu

MULTIRES = 10


# ----------------------------------------------------------------------------
# Positional embedding (standard NeRF get_embedder: identity + sin/cos of 2^k x)
# ----------------------------------------------------------------------------
def nerf_embed(x, multires=MULTIRES):
    parts = [x]
    for k in range(multires):
        f = 2.0 ** k
        parts.append(jnp.sin(f * x))
        parts.append(jnp.cos(f * x))
    return jnp.concatenate(parts, axis=-1)


def embed_dim_of(pos_dim, multires=MULTIRES):
    return pos_dim * (2 * multires + 1)


def _round_up(n, m):
    return ((n + m - 1) // m) * m


# ----------------------------------------------------------------------------
# Pallas kernel: 8 FC layers + ReLU + split skip + fused lane-dense output head
#   x_ref    : (TM, P*Epad)  bf16  packed/padded positional embedding tile
#   wx_ref   : (2, P*Epad, P*H) bf16  [fc1 x-part, skip-layer x-part] (block-diag)
#   wh_ref   : (7, P*H, P*H)    bf16  hidden->hidden weights (block-diag)
#   b_ref    : (8, P*H)         f32   biases (map-feature term folded into rows 0 and 5)
#   wout_ref : (P*H, P*Cpad)    bf16  fused [amp|phase|features|0-pad] head (block-diag)
#   bout_ref : (1, P*Cpad)      f32
#   out_ref  : (TM, P*Cpad)     f32
# ----------------------------------------------------------------------------
def attenuation_kernel(x_ref, wx_ref, wh_ref, b_ref, wout_ref, bout_ref, out_ref):
    relu = lambda v: jnp.maximum(v, 0.0)

    def dot(a, w):  # bf16 MXU inputs, f32 accumulation
        return jnp.dot(a.astype(jnp.bfloat16), w, preferred_element_type=jnp.float32)

    x = x_ref[...]                                     # bf16 (TM, P*Epad)
    b = b_ref[...]                                     # f32  (8, P*H)

    h = relu(dot(x, wx_ref[0]) + b[0:1])               # fc1  (map features folded into bias)
    h = relu(dot(h, wh_ref[0]) + b[1:2])               # fc_layers[0]
    h = relu(dot(h, wh_ref[1]) + b[2:3])               # fc_layers[1]
    h = relu(dot(h, wh_ref[2]) + b[3:4])               # fc_layers[2]
    h = relu(dot(h, wh_ref[3]) + b[4:5])               # fc_layers[3]
    # skip: relu(W @ concat([h, x_embed, mf]) + b) == relu(h@Wh + x_embed@Wx + (mf@Wmf + b))
    h = relu(dot(h, wh_ref[4]) + dot(x, wx_ref[1]) + b[5:6])   # fc_layers[4]
    h = relu(dot(h, wh_ref[5]) + b[6:7])               # fc_layers[5]
    h = relu(dot(h, wh_ref[6]) + b[7:8])               # fc_layers[6]

    out_ref[...] = dot(h, wout_ref[...]) + bout_ref[...]   # fused amp|phase|feature head


# ----------------------------------------------------------------------------
# Wrapper: embedding + constant folds + block-diagonal row packing + pallas_call
# ----------------------------------------------------------------------------
@functools.partial(jax.jit, static_argnames=("tile_rows",))
def attenuation_forward(x, map_features, params, *, tile_rows=2048):
    """x: [B, S, pos_dim] f32; map_features: [map_feature_dim] f32."""
    B, S, pos_dim = x.shape
    N = B * S
    E = embed_dim_of(pos_dim)
    H = params["fc1_w"].shape[1]
    F = params["feature_w"].shape[1]
    Fp2 = F + 2

    # Row-packing factor: pack P rows per packed row so the hidden dim fills 128 lanes.
    P = (128 // H) if (H < 128 and 128 % H == 0) else 1
    unit = 128 // P                      # per-row lane quantum -> packed dims are 128-multiples
    Epad = _round_up(E, unit)            # padded embedding width per row
    Cpad = _round_up(Fp2, unit)          # padded output width per row (lane-dense head)

    mf = map_features.astype(jnp.float32)[None, :]       # (1, Dm)

    # Fold the constant map-feature contributions into effective biases (exact, f32).
    w1x = params["fc1_w"][:E]                            # (E, H)
    b1_eff = mf @ params["fc1_w"][E:] + params["fc1_b"]  # (1, H)
    w6h = params["l4_w"][:H]                             # (H, H)
    w6x = params["l4_w"][H:H + E]                        # (E, H)
    b6_eff = mf @ params["l4_w"][H + E:] + params["l4_b"]

    # Fused lane-dense output head: [amp | phase | features | zero-pad].
    wout = jnp.concatenate([params["amp_w"], params["phase_w"], params["feature_w"]], axis=1)
    bout = jnp.concatenate([params["amp_b"], params["phase_b"], params["feature_b"]], axis=1)
    wout = jnp.pad(wout, ((0, 0), (0, Cpad - Fp2)))
    bout = jnp.pad(bout, ((0, 0), (0, Cpad - Fp2)))

    # Zero-pad embedding columns (and matching weight rows) so the input block is lane-dense.
    w1x = jnp.pad(w1x, ((0, Epad - E), (0, 0)))
    w6x = jnp.pad(w6x, ((0, Epad - E), (0, 0)))

    # P-way block-diagonal weights (exact zero off-diagonal -> no cross-row leakage).
    eye = jnp.eye(P, dtype=jnp.float32)
    bdiag = lambda w: jnp.kron(eye, w)
    tile_b = lambda b: jnp.tile(b, (1, P))
    bf = lambda a: a.astype(jnp.bfloat16)

    wx_stack = bf(jnp.stack([bdiag(w1x), bdiag(w6x)]))                         # (2, P*Epad, P*H)
    wh_stack = bf(jnp.stack(
        [bdiag(params[f"l{i}_w"]) for i in (0, 1, 2, 3)]
        + [bdiag(w6h)]
        + [bdiag(params[f"l{i}_w"]) for i in (5, 6)]))                         # (7, P*H, P*H)
    b_stack = jnp.concatenate(
        [tile_b(b) for b in (b1_eff, params["l0_b"], params["l1_b"], params["l2_b"],
                             params["l3_b"], b6_eff, params["l5_b"], params["l6_b"])],
        axis=0)                                                                # (8, P*H) f32
    wout_bd = bf(bdiag(wout))                                                  # (P*H, P*Cpad)
    bout_t = tile_b(bout)                                                      # (1, P*Cpad) f32

    # Positional embedding only (bf16) streams through the grid.
    x_embed = nerf_embed(x.reshape(N, pos_dim).astype(jnp.float32))
    x_embed = jnp.pad(x_embed, ((0, 0), (0, Epad - E))).astype(jnp.bfloat16)

    # Packed-row tiling.  tm is a multiple of 16 (bf16 sublane packing).
    Nr = -(-N // P)                                       # packed rows needed
    tm = min(tile_rows, _round_up(Nr, 16))
    # v7x megacore: if all rows fit one tile but there is plenty of work, use >=2 grid
    # steps so the "parallel" row axis can shard across both TensorCores.
    if 1024 <= Nr <= tile_rows:
        tm = _round_up(-(-Nr // 2), 16)
    Nr_pad = _round_up(Nr, tm)

    rows_needed = Nr_pad * P
    if rows_needed != N:
        x_embed = jnp.pad(x_embed, ((0, rows_needed - N), (0, 0)))
    x_packed = x_embed.reshape(Nr_pad, P * Epad)          # pure row-major reshape

    out_dim = P * Cpad
    out = pl.pallas_call(
        attenuation_kernel,
        grid=(Nr_pad // tm,),
        in_specs=[
            pl.BlockSpec((tm, P * Epad), lambda i: (i, 0)),
            pl.BlockSpec(wx_stack.shape, lambda i: (0, 0, 0)),
            pl.BlockSpec(wh_stack.shape, lambda i: (0, 0, 0)),
            pl.BlockSpec(b_stack.shape, lambda i: (0, 0)),
            pl.BlockSpec(wout_bd.shape, lambda i: (0, 0)),
            pl.BlockSpec(bout_t.shape, lambda i: (0, 0)),
        ],
        out_specs=pl.BlockSpec((tm, out_dim), lambda i: (i, 0)),
        out_shape=jax.ShapeDtypeStruct((Nr_pad, out_dim), jnp.float32),
        compiler_params=pltpu.CompilerParams(
            dimension_semantics=("parallel",),
            vmem_limit_bytes=48 * 1024 * 1024,
        ),
    )(x_packed, wx_stack, wh_stack, b_stack, wout_bd, bout_t)

    # Unpack rows (row-major reshape), strip padding, split the fused head.
    out = out.reshape(Nr_pad * P, Cpad)[:N, :Fp2]
    amp = out[:, 0].reshape(B, S)
    phase = out[:, 1].reshape(B, S)
    feat = out[:, 2:].reshape(B, S, F)
    return amp, phase, feat


# ----------------------------------------------------------------------------
# Deterministic parameter init (PyTorch-Linear-style uniform bounds, stored [in, out])
# ----------------------------------------------------------------------------
def init_params(key, pos_dim, map_feature_dim, hidden_dim, feature_dim, multires=MULTIRES):
    embed_dim = embed_dim_of(pos_dim, multires)
    D0 = embed_dim + map_feature_dim

    def linear(k, fan_in, fan_out):
        k1, k2 = jax.random.split(k)
        bound = 1.0 / (fan_in ** 0.5)
        w = jax.random.uniform(k1, (fan_in, fan_out), jnp.float32, -bound, bound)
        b = jax.random.uniform(k2, (1, fan_out), jnp.float32, -bound, bound)
        return w, b

    keys = jax.random.split(key, 11)
    params = {}
    params["fc1_w"], params["fc1_b"] = linear(keys[0], D0, hidden_dim)
    for i in (0, 1, 2, 3, 5, 6):
        params[f"l{i}_w"], params[f"l{i}_b"] = linear(keys[1 + i], hidden_dim, hidden_dim)
    # skip layer: full weight is (hidden + D0, hidden); the wrapper splits/folds it.
    params["l4_w"], params["l4_b"] = linear(keys[5], hidden_dim + D0, hidden_dim)
    params["feature_w"], params["feature_b"] = linear(keys[8], hidden_dim, feature_dim)
    params["amp_w"], params["amp_b"] = linear(keys[9], hidden_dim, 1)
    params["phase_w"], params["phase_b"] = linear(keys[10], hidden_dim, 1)
    return params


# ----------------------------------------------------------------------------
# Pure-JAX f32 reference (mirrors the PyTorch forward exactly, incl. concat skip)
# ----------------------------------------------------------------------------
def reference_forward(x, map_features, params):
    B, S, pos_dim = x.shape
    N = B * S
    xf = x.reshape(N, pos_dim)
    mf = jnp.broadcast_to(map_features[None, :], (N, map_features.shape[0]))
    init_in = jnp.concatenate([nerf_embed(xf), mf], axis=-1)

    h = jax.nn.relu(init_in @ params["fc1_w"] + params["fc1_b"])
    for i in range(7):
        if i == 4:
            hcat = jnp.concatenate([h, init_in], axis=-1)
            h = jax.nn.relu(hcat @ params["l4_w"] + params["l4_b"])
        else:
            h = jax.nn.relu(h @ params[f"l{i}_w"] + params[f"l{i}_b"])
    feat = (h @ params["feature_w"] + params["feature_b"]).reshape(B, S, -1)
    amp = (h @ params["amp_w"] + params["amp_b"]).reshape(B, S)
    phase = (h @ params["phase_w"] + params["phase_b"]).reshape(B, S)
    return amp, phase, feat


if __name__ == "__main__":
    # Small shapes consistent with the module's forward signature.
    batch, n_samples, pos_dim = 2, 8, 2
    map_feature_dim, hidden_dim, feature_dim = 64, 32, 32

    key = jax.random.PRNGKey(0)
    kx, kmf, kp = jax.random.split(key, 3)
    x = jax.random.normal(kx, (batch, n_samples, pos_dim), jnp.float32)
    map_features = jax.random.normal(kmf, (map_feature_dim,), jnp.float32)
    params = init_params(kp, pos_dim, map_feature_dim, hidden_dim, feature_dim)

    amp, phase, feat = attenuation_forward(x, map_features, params)
    jax.block_until_ready((amp, phase, feat))

    # Sanity-check against a pure-f32 JAX reference of the PyTorch forward.
    amp_r, phase_r, feat_r = reference_forward(x, map_features, params)
    assert amp.shape == (batch, n_samples)
    assert phase.shape == (batch, n_samples)
    assert feat.shape == (batch, n_samples, feature_dim)
    # Kernel uses bf16 MXU inputs with f32 accumulation -> loosened tolerance vs f32 ref.
    assert jnp.allclose(amp, amp_r, rtol=5e-2, atol=5e-2)
    assert jnp.allclose(phase, phase_r, rtol=5e-2, atol=5e-2)
    assert jnp.allclose(feat, feat_r, rtol=5e-2, atol=5e-2)

    # Row-packing correctness when N (=21) is NOT a multiple of the pack factor (4).
    x_odd = jax.random.normal(kx, (3, 7, pos_dim), jnp.float32)
    amp_o, phase_o, feat_o = attenuation_forward(x_odd, map_features, params)
    jax.block_until_ready((amp_o, phase_o, feat_o))
    amp_or, phase_or, feat_or = reference_forward(x_odd, map_features, params)
    assert jnp.allclose(amp_o, amp_or, rtol=5e-2, atol=5e-2)
    assert jnp.allclose(phase_o, phase_or, rtol=5e-2, atol=5e-2)
    assert jnp.allclose(feat_o, feat_or, rtol=5e-2, atol=5e-2)

    print("KERNEL_OK")
</pallas_src>

<mosaic_0001>
module attributes {stable_mosaic.version = 11 : i64} {
  func.func @attenuation_kernel(%arg0: i32, %arg1: memref<16x256xbf16, #tpu.memory_space<vmem>>, %arg2: memref<2x256x128xbf16, #tpu.memory_space<vmem>>, %arg3: memref<7x128x128xbf16, #tpu.memory_space<vmem>>, %arg4: memref<8x128xf32, #tpu.memory_space<vmem>>, %arg5: memref<128x256xbf16, #tpu.memory_space<vmem>>, %arg6: memref<1x256xf32, #tpu.memory_space<vmem>>, %arg7: memref<16x256xf32, #tpu.memory_space<vmem>>) attributes {dimension_semantics = [#tpu.dimension_semantics<parallel>], iteration_bounds = array<i64: 1>, scalar_prefetch = 0 : i64, scratch_operands = 0 : i64, tpu.core_type = #tpu.core_type<tc>, window_params = [{transform_indices = @transform_0, window_bounds = array<i64: 16, 256>}, {pipeline_mode = #tpu.pipeline_mode<synchronous>, transform_indices = @transform_1, window_bounds = array<i64: 2, 256, 128>}, {pipeline_mode = #tpu.pipeline_mode<synchronous>, transform_indices = @transform_2, window_bounds = array<i64: 7, 128, 128>}, {pipeline_mode = #tpu.pipeline_mode<synchronous>, transform_indices = @transform_3, window_bounds = array<i64: 8, 128>}, {pipeline_mode = #tpu.pipeline_mode<synchronous>, transform_indices = @transform_4, window_bounds = array<i64: 128, 256>}, {pipeline_mode = #tpu.pipeline_mode<synchronous>, transform_indices = @transform_5, window_bounds = array<i64: 1, 256>}, {transform_indices = @transform_6, window_bounds = array<i64: 16, 256>}]} {
    %c0 = arith.constant 0 : index
    %c0_0 = arith.constant 0 : index
    %0 = vector.load %arg1[%c0, %c0_0] : memref<16x256xbf16, #tpu.memory_space<vmem>>, vector<16x256xbf16>
    %c0_1 = arith.constant 0 : index
    %c0_2 = arith.constant 0 : index
    %1 = vector.load %arg4[%c0_1, %c0_2] : memref<8x128xf32, #tpu.memory_space<vmem>>, vector<8x128xf32>
    %c0_3 = arith.constant 0 : index
    %c0_4 = arith.constant 0 : index
    %c0_5 = arith.constant 0 : index
    %2 = vector.load %arg2[%c0_3, %c0_4, %c0_5] : memref<2x256x128xbf16, #tpu.memory_space<vmem>>, vector<1x256x128xbf16>
    %3 = vector.shape_cast %2 : vector<1x256x128xbf16> to vector<256x128xbf16>
    %cst = arith.constant dense<0.000000e+00> : vector<16x128xf32>
    %4 = tpu.matmul %0, %3, %cst {dimension_numbers = #tpu.dot_dimension_numbers<[1], [0], [0], [1], [0, 0, 1, 1], [], []>} : vector<16x256xbf16>, vector<256x128xbf16>, vector<16x128xf32> -> vector<16x128xf32>
    %5 = vector.extract_strided_slice %1 {offsets = [0, 0], sizes = [1, 128], strides = [1, 1]} : vector<8x128xf32> to vector<1x128xf32>
    %6 = vector.broadcast %5 : vector<1x128xf32> to vector<16x128xf32>
    %7 = arith.addf %4, %6 : vector<16x128xf32>
    %cst_6 = arith.constant 0.000000e+00 : f32
    %8 = vector.broadcast %cst_6 : f32 to vector<16x128xf32>
    %9 = arith.maximumf %7, %8 : vector<16x128xf32>
    %c0_7 = arith.constant 0 : index
    %c0_8 = arith.constant 0 : index
    %c0_9 = arith.constant 0 : index
    %10 = vector.load %arg3[%c0_7, %c0_8, %c0_9] : memref<7x128x128xbf16, #tpu.memory_space<vmem>>, vector<1x128x128xbf16>
    %11 = vector.shape_cast %10 : vector<1x128x128xbf16> to vector<128x128xbf16>
    %12 = arith.truncf %9 : vector<16x128xf32> to vector<16x128xbf16>
    %cst_10 = arith.constant dense<0.000000e+00> : vector<16x128xf32>
    %13 = tpu.matmul %12, %11, %cst_10 {dimension_numbers = #tpu.dot_dimension_numbers<[1], [0], [0], [1], [0, 0, 1, 1], [], []>} : vector<16x128xbf16>, vector<128x128xbf16>, vector<16x128xf32> -> vector<16x128xf32>
    %14 = vector.extract_strided_slice %1 {offsets = [1, 0], sizes = [1, 128], strides = [1, 1]} : vector<8x128xf32> to vector<1x128xf32>
    %15 = vector.broadcast %14 : vector<1x128xf32> to vector<16x128xf32>
    %16 = arith.addf %13, %15 : vector<16x128xf32>
    %cst_11 = arith.constant 0.000000e+00 : f32
    %17 = vector.broadcast %cst_11 : f32 to vector<16x128xf32>
    %18 = arith.maximumf %16, %17 : vector<16x128xf32>
    %c1 = arith.constant 1 : index
    %c0_12 = arith.constant 0 : index
    %c0_13 = arith.constant 0 : index
    %19 = vector.load %arg3[%c1, %c0_12, %c0_13] : memref<7x128x128xbf16, #tpu.memory_space<vmem>>, vector<1x128x128xbf16>
    %20 = vector.shape_cast %19 : vector<1x128x128xbf16> to vector<128x128xbf16>
    %21 = arith.truncf %18 : vector<16x128xf32> to vector<16x128xbf16>
    %cst_14 = arith.constant dense<0.000000e+00> : vector<16x128xf32>
    %22 = tpu.matmul %21, %20, %cst_14 {dimension_numbers = #tpu.dot_dimension_numbers<[1], [0], [0], [1], [0, 0, 1, 1], [], []>} : vector<16x128xbf16>, vector<128x128xbf16>, vector<16x128xf32> -> vector<16x128xf32>
    %23 = vector.extract_strided_slice %1 {offsets = [2, 0], sizes = [1, 128], strides = [1, 1]} : vector<8x128xf32> to vector<1x128xf32>
    %24 = vector.broadcast %23 : vector<1x128xf32> to vector<16x128xf32>
    %25 = arith.addf %22, %24 : vector<16x128xf32>
    %cst_15 = arith.constant 0.000000e+00 : f32
    %26 = vector.broadcast %cst_15 : f32 to vector<16x128xf32>
    %27 = arith.maximumf %25, %26 : vector<16x128xf32>
    %c2 = arith.constant 2 : index
    %c0_16 = arith.constant 0 : index
    %c0_17 = arith.constant 0 : index
    %28 = vector.load %arg3[%c2, %c0_16, %c0_17] : memref<7x128x128xbf16, #tpu.memory_space<vmem>>, vector<1x128x128xbf16>
    %29 = vector.shape_cast %28 : vector<1x128x128xbf16> to vector<128x128xbf16>
    %30 = arith.truncf %27 : vector<16x128xf32> to vector<16x128xbf16>
    %cst_18 = arith.constant dense<0.000000e+00> : vector<16x128xf32>
    %31 = tpu.matmul %30, %29, %cst_18 {dimension_numbers = #tpu.dot_dimension_numbers<[1], [0], [0], [1], [0, 0, 1, 1], [], []>} : vector<16x128xbf16>, vector<128x128xbf16>, vector<16x128xf32> -> vector<16x128xf32>
    %32 = vector.extract_strided_slice %1 {offsets = [3, 0], sizes = [1, 128], strides = [1, 1]} : vector<8x128xf32> to vector<1x128xf32>
    %33 = vector.broadcast %32 : vector<1x128xf32> to vector<16x128xf32>
    %34 = arith.addf %31, %33 : vector<16x128xf32>
    %cst_19 = arith.constant 0.000000e+00 : f32
    %35 = vector.broadcast %cst_19 : f32 to vector<16x128xf32>
    %36 = arith.maximumf %34, %35 : vector<16x128xf32>
    %c3 = arith.constant 3 : index
    %c0_20 = arith.constant 0 : index
    %c0_21 = arith.constant 0 : index
    %37 = vector.load %arg3[%c3, %c0_20, %c0_21] : memref<7x128x128xbf16, #tpu.memory_space<vmem>>, vector<1x128x128xbf16>
    %38 = vector.shape_cast %37 : vector<1x128x128xbf16> to vector<128x128xbf16>
    %39 = arith.truncf %36 : vector<16x128xf32> to vector<16x128xbf16>
    %cst_22 = arith.constant dense<0.000000e+00> : vector<16x128xf32>
    %40 = tpu.matmul %39, %38, %cst_22 {dimension_numbers = #tpu.dot_dimension_numbers<[1], [0], [0], [1], [0, 0, 1, 1], [], []>} : vector<16x128xbf16>, vector<128x128xbf16>, vector<16x128xf32> -> vector<16x128xf32>
    %41 = vector.extract_strided_slice %1 {offsets = [4, 0], sizes = [1, 128], strides = [1, 1]} : vector<8x128xf32> to vector<1x128xf32>
    %42 = vector.broadcast %41 : vector<1x128xf32> to vector<16x128xf32>
    %43 = arith.addf %40, %42 : vector<16x128xf32>
    %cst_23 = arith.constant 0.000000e+00 : f32
    %44 = vector.broadcast %cst_23 : f32 to vector<16x128xf32>
    %45 = arith.maximumf %43, %44 : vector<16x128xf32>
    %c4 = arith.constant 4 : index
    %c0_24 = arith.constant 0 : index
    %c0_25 = arith.constant 0 : index
    %46 = vector.load %arg3[%c4, %c0_24, %c0_25] : memref<7x128x128xbf16, #tpu.memory_space<vmem>>, vector<1x128x128xbf16>
    %47 = vector.shape_cast %46 : vector<1x128x128xbf16> to vector<128x128xbf16>
    %48 = arith.truncf %45 : vector<16x128xf32> to vector<16x128xbf16>
    %cst_26 = arith.constant dense<0.000000e+00> : vector<16x128xf32>
    %49 = tpu.matmul %48, %47, %cst_26 {dimension_numbers = #tpu.dot_dimension_numbers<[1], [0], [0], [1], [0, 0, 1, 1], [], []>} : vector<16x128xbf16>, vector<128x128xbf16>, vector<16x128xf32> -> vector<16x128xf32>
    %c1_27 = arith.constant 1 : index
    %c0_28 = arith.constant 0 : index
    %c0_29 = arith.constant 0 : index
    %50 = vector.load %arg2[%c1_27, %c0_28, %c0_29] : memref<2x256x128xbf16, #tpu.memory_space<vmem>>, vector<1x256x128xbf16>
    %51 = vector.shape_cast %50 : vector<1x256x128xbf16> to vector<256x128xbf16>
    %cst_30 = arith.constant dense<0.000000e+00> : vector<16x128xf32>
    %52 = tpu.matmul %0, %51, %cst_30 {dimension_numbers = #tpu.dot_dimension_numbers<[1], [0], [0], [1], [0, 0, 1, 1], [], []>} : vector<16x256xbf16>, vector<256x128xbf16>, vector<16x128xf32> -> vector<16x128xf32>
    %53 = arith.addf %49, %52 : vector<16x128xf32>
    %54 = vector.extract_strided_slice %1 {offsets = [5, 0], sizes = [1, 128], strides = [1, 1]} : vector<8x128xf32> to vector<1x128xf32>
    %55 = vector.broadcast %54 : vector<1x128xf32> to vector<16x128xf32>
    %56 = arith.addf %53, %55 : vector<16x128xf32>
    %cst_31 = arith.constant 0.000000e+00 : f32
    %57 = vector.broadcast %cst_31 : f32 to vector<16x128xf32>
    %58 = arith.maximumf %56, %57 : vector<16x128xf32>
    %c5 = arith.constant 5 : index
    %c0_32 = arith.constant 0 : index
    %c0_33 = arith.constant 0 : index
    %59 = vector.load %arg3[%c5, %c0_32, %c0_33] : memref<7x128x128xbf16, #tpu.memory_space<vmem>>, vector<1x128x128xbf16>
    %60 = vector.shape_cast %59 : vector<1x128x128xbf16> to vector<128x128xbf16>
    %61 = arith.truncf %58 : vector<16x128xf32> to vector<16x128xbf16>
    %cst_34 = arith.constant dense<0.000000e+00> : vector<16x128xf32>
    %62 = tpu.matmul %61, %60, %cst_34 {dimension_numbers = #tpu.dot_dimension_numbers<[1], [0], [0], [1], [0, 0, 1, 1], [], []>} : vector<16x128xbf16>, vector<128x128xbf16>, vector<16x128xf32> -> vector<16x128xf32>
    %63 = vector.extract_strided_slice %1 {offsets = [6, 0], sizes = [1, 128], strides = [1, 1]} : vector<8x128xf32> to vector<1x128xf32>
    %64 = vector.broadcast %63 : vector<1x128xf32> to vector<16x128xf32>
    %65 = arith.addf %62, %64 : vector<16x128xf32>
    %cst_35 = arith.constant 0.000000e+00 : f32
    %66 = vector.broadcast %cst_35 : f32 to vector<16x128xf32>
    %67 = arith.maximumf %65, %66 : vector<16x128xf32>
    %c6 = arith.constant 6 : index
    %c0_36 = arith.constant 0 : index
    %c0_37 = arith.constant 0 : index
    %68 = vector.load %arg3[%c6, %c0_36, %c0_37] : memref<7x128x128xbf16, #tpu.memory_space<vmem>>, vector<1x128x128xbf16>
    %69 = vector.shape_cast %68 : vector<1x128x128xbf16> to vector<128x128xbf16>
    %70 = arith.truncf %67 : vector<16x128xf32> to vector<16x128xbf16>
    %cst_38 = arith.constant dense<0.000000e+00> : vector<16x128xf32>
    %71 = tpu.matmul %70, %69, %cst_38 {dimension_numbers = #tpu.dot_dimension_numbers<[1], [0], [0], [1], [0, 0, 1, 1], [], []>} : vector<16x128xbf16>, vector<128x128xbf16>, vector<16x128xf32> -> vector<16x128xf32>
    %72 = vector.extract_strided_slice %1 {offsets = [7, 0], sizes = [1, 128], strides = [1, 1]} : vector<8x128xf32> to vector<1x128xf32>
    %73 = vector.broadcast %72 : vector<1x128xf32> to vector<16x128xf32>
    %74 = arith.addf %71, %73 : vector<16x128xf32>
    %cst_39 = arith.constant 0.000000e+00 : f32
    %75 = vector.broadcast %cst_39 : f32 to vector<16x128xf32>
    %76 = arith.maximumf %74, %75 : vector<16x128xf32>
    %c0_40 = arith.constant 0 : index
    %c0_41 = arith.constant 0 : index
    %77 = vector.load %arg5[%c0_40, %c0_41] : memref<128x256xbf16, #tpu.memory_space<vmem>>, vector<128x256xbf16>
    %78 = arith.truncf %76 : vector<16x128xf32> to vector<16x128xbf16>
    %cst_42 = arith.constant dense<0.000000e+00> : vector<16x256xf32>
    %79 = tpu.matmul %78, %77, %cst_42 {dimension_numbers = #tpu.dot_dimension_numbers<[1], [0], [0], [1], [0, 0, 1, 1], [], []>} : vector<16x128xbf16>, vector<128x256xbf16>, vector<16x256xf32> -> vector<16x256xf32>
    %c0_43 = arith.constant 0 : index
    %c0_44 = arith.constant 0 : index
    %80 = vector.load %arg6[%c0_43, %c0_44] : memref<1x256xf32, #tpu.memory_space<vmem>>, vector<1x256xf32>
    %81 = vector.broadcast %80 : vector<1x256xf32> to vector<16x256xf32>
    %82 = arith.addf %79, %81 : vector<16x256xf32>
    %c0_45 = arith.constant 0 : index
    %c0_46 = arith.constant 0 : index
    %83 = vector.load %arg7[%c0_45, %c0_46] : memref<16x256xf32, #tpu.memory_space<vmem>>, vector<16x256xf32>
    tpu.vector_store %arg7[%c0_45, %c0_46], %82 {strides = array<i32>} : memref<16x256xf32, #tpu.memory_space<vmem>>, vector<16x256xf32>,
    return
  }
  func.func @transform_0(%arg0: i32) -> (i32, i32) {
    %c0_i32 = arith.constant 0 : i32
    %c0_i32_0 = arith.constant 0 : i32
    return %arg0, %c0_i32 : i32, i32
  }
  func.func @transform_1(%arg0: i32) -> (i32, i32, i32) {
    %c0_i32 = arith.constant 0 : i32
    %c0_i32_0 = arith.constant 0 : i32
    %c0_i32_1 = arith.constant 0 : i32
    %c0_i32_2 = arith.constant 0 : i32
    return %c0_i32, %c0_i32_0, %c0_i32_1 : i32, i32, i32
  }
  func.func @transform_2(%arg0: i32) -> (i32, i32, i32) {
    %c0_i32 = arith.constant 0 : i32
    %c0_i32_0 = arith.constant 0 : i32
    %c0_i32_1 = arith.constant 0 : i32
    %c0_i32_2 = arith.constant 0 : i32
    return %c0_i32, %c0_i32_0, %c0_i32_1 : i32, i32, i32
  }
  func.func @transform_3(%arg0: i32) -> (i32, i32) {
    %c0_i32 = arith.constant 0 : i32
    %c0_i32_0 = arith.constant 0 : i32
    %c0_i32_1 = arith.constant 0 : i32
    return %c0_i32, %c0_i32_0 : i32, i32
  }
  func.func @transform_4(%arg0: i32) -> (i32, i32) {
    %c0_i32 = arith.constant 0 : i32
    %c0_i32_0 = arith.constant 0 : i32
    %c0_i32_1 = arith.constant 0 : i32
    return %c0_i32, %c0_i32_0 : i32, i32
  }
  func.func @transform_5(%arg0: i32) -> (i32, i32) {
    %c0_i32 = arith.constant 0 : i32
    %c0_i32_0 = arith.constant 0 : i32
    %c0_i32_1 = arith.constant 0 : i32
    return %c0_i32, %c0_i32_0 : i32, i32
  }
  func.func @transform_6(%arg0: i32) -> (i32, i32) {
    %c0_i32 = arith.constant 0 : i32
    %c0_i32_0 = arith.constant 0 : i32
    return %arg0, %c0_i32 : i32, i32
  }
}

</mosaic_0001>

<bundles_post_ra>
// kernel: squeeze.2
= control target key start
LH: loop header
LB: loop body
LE: loop exit
PB: predicated region body
PF: predicated region fallthrough
CT: control target
= control target key end

     0   :  { %s85_s0 = inlined_call_operand.vmem [shape: f32[16], index: 0, kind: input, shape index: {}]   ;;  %s86_s1 = inlined_call_operand.hbm [shape: f32[2,8], index: 1, kind: output, shape index: {}]  }
   0x1   :  { %v5_v0 = vld [vmem:[%s85_s0] sm:$0x1] }
   0x2   :  { %2 = vsyncpa [#allocation1], 0  ;;  %6 = vst [vmem:[#allocation3] sm:$0x1] %v5_v0  ;;  %vm8_vm0 = vcmask 64512   ;;  %s58_s0 = smov 120  }
   0x3   :  { %s59_s8 = smov [#allocation0]  }
   0x4   :  { %s26_s9 = sshll.u32 %s59_s8, 4  ;;  %s27_s9 = int_to_ptr.vmem [resolvable:$true] %s26_s9 }
   0x5   :  { %s34_s10 = scalar_lea.vmem %s27_s9, 32  ;;  %p39_p1 = scmp.lt.s32.totalorder %s27_s9, %s27_s9 }
   0x6   :  { %p35_p0 = scmp.ne.s32.totalorder %s27_s9, %s34_s10  ;;  %p40_p2 = scmp.lt.s32.totalorder %s34_s10, %s34_s10 }
   0x8   :  { %p41_p3 = por %p40_p2, %p39_p1 }
   0x9   :  { %v10_v1 = vld [vmem:[#allocation3] sm:$0x1]  }
   0xa   :  { %v7_v2 = vld [vmem:[#allocation3] sm:$0x1]   ;;  %11 = vrot.lane.b32.xlu0 %v10_v1, %s58_s0  ;;  %p42_p4 = pnand %p41_p3, %p35_p0 }
   0xb   :  { %9 = vst.msk [vmem:[#allocation2] sm:$0x1] %vm8_vm0, %v7_v2  }
  0x7c   :  { %v12_v3 = vpop.permute.xlu0 %11  }
  0x7d   :  { %15 = vst.msk [vmem:[#allocation2 + $0x1] sm:$0x1] %vm8_vm0, %v12_v3  }
  0x84   :  { %v19_v4 = vld [vmem:[#allocation2] sm:$0x3] }
  0x85   :  { %21 = vst [vmem:[#allocation0] sm:$0x3] %v19_v4 }
  0x86   :  { %45 = shalt.err (!%p42_p4)
}
  0x87   :  { %s46_s13 = scalar_lea.hbm %s86_s1, 32 }
  0x88   :  { %p47_p5 = scmp.ne.s32.totalorder %s86_s1, %s46_s13  ;;  %p50_p6 = scmp.lt.u32.totalorder %s46_s13, %s86_s1 }
  0x8a   :  { %p52_p7 = pnand %p50_p6, %p47_p5 }
  0x8c   :  { %55 = shalt.err (!%p52_p7)
}
  0x8d   :  { %29 = dma.vmem_to_hbm [thread:$0]  %s27_s9, 32, %s86_s1, [#allocation1]  }
  0x8e   :  { %56 = dma.done.wait [#allocation1], 32  }
  0x8f   :  { %57 = vsyncadd [#allocation1], 4294967264 }
  0x90   :  { %31 = vsyncpa [#allocation1], 1 }

// kernel: attenuation_forward.1
= control target key start
LH: loop header
LB: loop body
LE: loop exit
PB: predicated region body
PF: predicated region fallthrough
CT: control target
= control target key end

     0   :  { %v1933_v1 = vmov 0.0   ;;  %vm1934_vm0 = vmmov 0   ;;  %v59_v33 = vlaneseq  ;;  %s2413_s1 = inlined_call_operand.vmem [shape: bf16[2,256,128], index: 1, kind: input, shape index: {}]   ;;  %s2414_s0 = inlined_call_operand.vmem [shape: bf16[16,256], index: 0, kind: input, shape index: {}]   ;;  %s2415_s2 = inlined_call_operand.vmem [shape: bf16[7,128,128], index: 2, kind: input, shape index: {}]   ;;  %s2416_s3 = inlined_call_operand.vmem [shape: f32[8,128], index: 3, kind: input, shape index: {}]   ;;  %s2417_s4 = inlined_call_operand.vmem [shape: bf16[128,256], index: 4, kind: input, shape index: {}]   ;;  %s2418_s5 = inlined_call_operand.vmem [shape: f32[1,256], index: 5, kind: input, shape index: {}]   ;;  %s2419_s6 = inlined_call_operand.vmem [shape: f32[16,256], index: 6, kind: output, shape index: {}]  }
   0x1   :  { %v1818_v0 = vld [vmem:[%s2413_s1 + $0x40] sm:$0xff]   ;;  %1675 = vmatprep.subr.bf16.mxu1 %v1933_v1  ;;  %v1820_v3 = vld [vmem:[%s2413_s1 + $0x48] sm:$0xff]   ;;  %v1822_v5 = vld [vmem:[%s2413_s1 + $0x50] sm:$0xff]   ;;  %1691 = vmatprep.mubr.msk.bf16.mxu1 %vm1934_vm0, %v1933_v1 }
   0x2   :  { %v1819_v2 = vld [vmem:[%s2413_s1] sm:$0xff]   ;;  %1568 = vmatprep.subr.bf16.mxu0 %v1818_v0  ;;  %v1821_v4 = vld [vmem:[%s2413_s1 + $0x8] sm:$0xff]   ;;  %v1823_v6 = vld [vmem:[%s2413_s1 + $0x10] sm:$0xff]   ;;  %v2093_v34 = vshrl.u32 %v59_v33, 7 }
   0x3   :  { %1569 = vmatpush3.bf16.msra.mxu0 %v1819_v2  ;;  %v1824_v7 = vld [vmem:[%s2413_s1 + $0x58] sm:$0xff]   ;;  %v1826_v9 = vld [vmem:[%s2413_s1 + $0x60] sm:$0xff]   ;;  %v1828_v11 = vld [vmem:[%s2413_s1 + $0x68] sm:$0xff]  }
   0x4   :  { %1570 = vmatprep.subr.bf16.mxu0 %v1820_v3  ;;  %v1825_v8 = vld [vmem:[%s2413_s1 + $0x18] sm:$0xff]   ;;  %v1827_v10 = vld [vmem:[%s2413_s1 + $0x20] sm:$0xff]   ;;  %v1829_v12 = vld [vmem:[%s2413_s1 + $0x28] sm:$0xff]   ;;  %v61_v35 = vsub.s32 0, %v2093_v34  ;;  %v231_v57 = vsub.s32 1, %v2093_v34 }
   0x5   :  { %v2011_v13 = vld [vmem:[%s2414_s0 + $0x4] ss:$8 sps:$4 sm:$0xff]   ;;  %v1830_v15 = vld [vmem:[%s2413_s1 + $0x70] sm:$0xff]   ;;  %v1832_v18 = vld [vmem:[%s2413_s1 + $0x78] sm:$0xff]  }
   0x6   :  { %v1837_v14 = vld [vmem:[%s2415_s2] sm:$0xff]   ;;  %201 = vmatprep.mubr.bf16.mxu0 %v2011_v13  ;;  %v1838_v16 = vld [vmem:[%s2415_s2 + $0x8] sm:$0xff]   ;;  %v1831_v17 = vld [vmem:[%s2413_s1 + $0x30] sm:$0xff]  }
   0x7   :  { %1571 = vmatpush3.bf16.msra.mxu0 %v1821_v4  ;;  %1676 = vmatpush3.bf16.msra.mxu1 %v1837_v14  ;;  %v1839_v19 = vld [vmem:[%s2415_s2 + $0x10] sm:$0xff]   ;;  %v1833_v20 = vld [vmem:[%s2413_s1 + $0x38] sm:$0xff]   ;;  %v2043_v22 = vld [vmem:[%s2414_s0] ss:$8 sps:$4 sm:$0xff]   ;;  %v344_v14 = vsub.s32 2, %v2093_v34 }
   0x8   :  { %1572 = vmatprep.subr.bf16.mxu0 %v1822_v5  ;;  %1677 = vmatprep.subr.bf16.mxu1 %v1933_v1  ;;  %v1840_v21 = vld [vmem:[%s2415_s2 + $0x18] sm:$0xff]   ;;  %v1841_v23 = vld [vmem:[%s2415_s2 + $0x20] sm:$0xff]   ;;  %v1842_v24 = vld [vmem:[%s2415_s2 + $0x28] sm:$0xff]  }
   0x9   :  { %v1843_v25 = vld [vmem:[%s2415_s2 + $0x30] sm:$0xff]   ;;  %v1844_v26 = vld [vmem:[%s2415_s2 + $0x38] sm:$0xff]   ;;  %v1845_v27 = vld [vmem:[%s2415_s2 + $0x40] sm:$0xff]  }
   0xa   :  { %v1846_v28 = vld [vmem:[%s2415_s2 + $0x48] sm:$0xff]   ;;  %v1847_v29 = vld [vmem:[%s2415_s2 + $0x50] sm:$0xff]   ;;  %v1848_v30 = vld [vmem:[%s2415_s2 + $0x58] sm:$0xff]  }
   0xb   :  { %1573 = vmatpush3.bf16.msra.mxu0 %v1823_v6  ;;  %1678 = vmatpush3.bf16.msra.mxu1 %v1838_v16  ;;  %v1849_v31 = vld [vmem:[%s2415_s2 + $0x60] sm:$0xff]   ;;  %v1850_v32 = vld [vmem:[%s2415_s2 + $0x68] sm:$0xff]   ;;  %v1851_v49 = vld [vmem:[%s2415_s2 + $0x70] sm:$0xff]  }
   0xc   :  { %1574 = vmatprep.subr.bf16.mxu0 %v1824_v7  ;;  %1679 = vmatprep.subr.bf16.mxu1 %v1933_v1  ;;  %v2099_v36 = vld [vmem:[%s2416_s3] sm:$0xff]  ;;  %v1852_v50 = vld [vmem:[%s2415_s2 + $0x78] sm:$0xff]   ;;  %v1854_v52 = vld [vmem:[%s2415_s2 + $0x88] sm:$0xff]  }
   0xd   :  { %v62_v38 = vrot.slane %v2099_v36, %v61_v35  ;;  %v1853_v51 = vld [vmem:[%s2415_s2 + $0x80] sm:$0xff]   ;;  %v1855_v53 = vld [vmem:[%s2415_s2 + $0x90] sm:$0xff]   ;;  %v1856_v54 = vld [vmem:[%s2415_s2 + $0x98] sm:$0xff]   ;;  %v232_v58 = vrot.slane %v2099_v36, %v231_v57 }
   0xe   :  { %v1857_v55 = vld [vmem:[%s2415_s2 + $0xa0] sm:$0xff]   ;;  %v1858_v56 = vld [vmem:[%s2415_s2 + $0xa8] sm:$0xff]   ;;  %v1859_v5 = vld [vmem:[%s2415_s2 + $0xb0] sm:$0xff]  }
   0xf   :  { %1575 = vmatpush3.bf16.msra.mxu0 %v1825_v8  ;;  %1680 = vmatpush3.bf16.msra.mxu1 %v1839_v19  ;;  %v1860_v6 = vld [vmem:[%s2415_s2 + $0xb8] sm:$0xff]   ;;  %v1861_v7 = vld [vmem:[%s2415_s2 + $0xc0] sm:$0xff]   ;;  %v1862_v8 = vld [vmem:[%s2415_s2 + $0xc8] sm:$0xff]  }
  0x10   :  { %1576 = vmatprep.subr.bf16.mxu0 %v1826_v9  ;;  %1681 = vmatprep.subr.bf16.mxu1 %v1933_v1  ;;  %v1863_v9 = vld [vmem:[%s2415_s2 + $0xd0] sm:$0xff]   ;;  %v1877_v33 = vld [vmem:[%s2413_s1 + $0xd8] sm:$0xff]  }
  0x13   :  { %1577 = vmatpush3.bf16.msra.mxu0 %v1827_v10  ;;  %1682 = vmatpush3.bf16.msra.mxu1 %v1840_v21  ;;  %v1864_v10 = vld [vmem:[%s2415_s2 + $0xd8] sm:$0xff]  }
  0x14   :  { %1578 = vmatprep.subr.bf16.mxu0 %v1828_v11  ;;  %1683 = vmatprep.subr.bf16.mxu1 %v1933_v1  ;;  %v1865_v11 = vld [vmem:[%s2415_s2 + $0xe0] sm:$0xff]  }
  0x17   :  { %1579 = vmatpush3.bf16.msra.mxu0 %v1829_v12  ;;  %1684 = vmatpush3.bf16.msra.mxu1 %v1841_v23  ;;  %v1866_v12 = vld [vmem:[%s2415_s2 + $0xe8] sm:$0xff]  }
  0x18   :  { %1580 = vmatprep.subr.bf16.mxu0 %v1830_v15  ;;  %1685 = vmatprep.subr.bf16.mxu1 %v1933_v1  ;;  %v345_v15 = vrot.slane %v2099_v36, %v344_v14 }
  0x1b   :  { %1581 = vmatpush3.bf16.msra.mxu0 %v1831_v17  ;;  %1686 = vmatpush3.bf16.msra.mxu1 %v1842_v24 }
  0x1c   :  { %1582 = vmatprep.subr.bf16.mxu0 %v1832_v18  ;;  %1687 = vmatprep.subr.bf16.mxu1 %v1933_v1 }
  0x1f   :  { %1583 = vmatpush3.bf16.msra.mxu0 %v1833_v20  ;;  %1688 = vmatpush3.bf16.msra.mxu1 %v1843_v25 }
  0x20   :  { %1695 = vmatprep.subr.bf16.mxu0 %v1933_v1  ;;  %1689 = vmatprep.subr.bf16.mxu1 %v1933_v1 }
  0x22   :  { %202 = vmatmul.mubr.bf16.vlgmr.msra.gmra.mrb[0].mxu0 %v2043_v22 }
  0x23   :  { %1690 = vmatpush3.bf16.msra.mxu1 %v1844_v26  ;;  %1711 = vmatprep.mubr.msk.bf16.mxu0 %vm1934_vm0, %v1933_v1  ;;  %v1867_v26 = vld [vmem:[%s2415_s2 + $0xf0] sm:$0xff]  }
  0x24   :  { %1715 = vmatprep.subr.bf16.mxu1 %v1933_v1  ;;  %1696 = vmatpush3.bf16.msra.mxu0 %v1845_v27  ;;  %v1868_v27 = vld [vmem:[%s2415_s2 + $0xf8] sm:$0xff]  }
  0x25   :  { %1697 = vmatprep.subr.bf16.mxu0 %v1933_v1 }
  0x28   :  { %1698 = vmatpush3.bf16.msra.mxu0 %v1846_v28  ;;  %v1869_v28 = vld [vmem:[%s2413_s1 + $0xc0] sm:$0xff]  }
  0x29   :  { %1699 = vmatprep.subr.bf16.mxu0 %v1933_v1 }
  0x2c   :  { %1700 = vmatpush3.bf16.msra.mxu0 %v1847_v29  ;;  %v1871_v29 = vld [vmem:[%s2413_s1 + $0xc8] sm:$0xff]  }
  0x2d   :  { %1701 = vmatprep.subr.bf16.mxu0 %v1933_v1 }
  0x30   :  { %1702 = vmatpush3.bf16.msra.mxu0 %v1848_v30  ;;  %v1872_v30 = vld [vmem:[%s2413_s1 + $0x88] sm:$0xff]  }
  0x31   :  { %1703 = vmatprep.subr.bf16.mxu0 %v1933_v1 }
  0x34   :  { %1704 = vmatpush3.bf16.msra.mxu0 %v1849_v31  ;;  %v1874_v31 = vld [vmem:[%s2413_s1 + $0xd0] sm:$0xff]  }
  0x35   :  { %1705 = vmatprep.subr.bf16.mxu0 %v1933_v1 }
  0x38   :  { %1706 = vmatpush3.bf16.msra.mxu0 %v1850_v32  ;;  %v1875_v32 = vld [vmem:[%s2413_s1 + $0x90] sm:$0xff]  }
  0x39   :  { %1707 = vmatprep.subr.bf16.mxu0 %v1933_v1 }
  0x3c   :  { %1708 = vmatpush3.bf16.msra.mxu0 %v1851_v49 }
  0x3d   :  { %1709 = vmatprep.subr.bf16.mxu0 %v1933_v1 }
  0x40   :  { %1710 = vmatpush3.bf16.msra.mxu0 %v1852_v50 }
  0x41   :  { %1735 = vmatprep.subr.bf16.mxu0 %v1933_v1 }
  0xf5   :  { %v1584_v37 = vpop.f32.mrb[0].mxu0 }
  0xf6   :  { %v1585_v39 = vpop.f32.mrb[1].mxu0 }
  0xf7   :  { %v1586_v40 = vadd.f32 %v1585_v39, %v1584_v37  ;;  %v1587_v41 = vpop.f32.mrb[2].mxu0  ;;  %v1878_v37 = vld [vmem:[%s2413_s1 + $0x98] sm:$0xff]   ;;  %v1881_v39 = vld [vmem:[%s2413_s1 + $0xa0] sm:$0xff]  }
  0xf8   :  { %v1588_v42 = vpop.f32.mrb[3].mxu0 }
  0xf9   :  { %v204_v43 = vadd.f32 %v1586_v40, %v62_v38  ;;  %v1589_v44 = vadd.f32 %v1588_v42, %v1587_v41  ;;  %v1883_v40 = vld [vmem:[%s2413_s1 + $0xe8] sm:$0xff]   ;;  %v1886_v42 = vld [vmem:[%s2413_s1 + $0xf0] sm:$0xff]  }
  0xfa   :  { %v1884_v41 = vld [vmem:[%s2413_s1 + $0xa8] sm:$0xff]  }
  0xfb   :  { %v207_v45 = vadd.f32 %v1589_v44, %v62_v38  ;;  %v210_v46 = vmax.f32 %v204_v43, 0.0  ;;  %v1880_v38 = vld [vmem:[%s2413_s1 + $0xe0] sm:$0xff]   ;;  %v1887_v43 = vld [vmem:[%s2413_s1 + $0xb0] sm:$0xff]   ;;  %v1889_v44 = vld [vmem:[%s2413_s1 + $0xf8] sm:$0xff]  }
  0xfd   :  { %v211_v47 = vmax.f32 %v207_v45, 0.0  ;;  %v457_v45 = vsub.s32 3, %v2093_v34 }
  0xff   :  { %v228_v48 = vpack.c.bf16 %v211_v47, %v210_v46  ;;  %v458_v46 = vrot.slane %v2099_v36, %v457_v45 }
 0x101   :  { %1692 = vmatmul.mubr.bf16.vlgmr.msra.gmra.mrb[0].mxu1 %v228_v48 }
 0x102   :  { %1731 = vmatprep.mubr.msk.bf16.mxu1 %vm1934_vm0, %v1933_v1  ;;  %1716 = vmatpush3.bf16.msra.mxu1 %v1853_v51 }
 0x103   :  { %1717 = vmatprep.subr.bf16.mxu1 %v1933_v1 }
 0x106   :  { %1718 = vmatpush3.bf16.msra.mxu1 %v1854_v52 }
 0x107   :  { %1719 = vmatprep.subr.bf16.mxu1 %v1933_v1 }
 0x10a   :  { %1720 = vmatpush3.bf16.msra.mxu1 %v1855_v53 }
 0x10b   :  { %1721 = vmatprep.subr.bf16.mxu1 %v1933_v1 }
 0x10e   :  { %1722 = vmatpush3.bf16.msra.mxu1 %v1856_v54 }
 0x10f   :  { %1723 = vmatprep.subr.bf16.mxu1 %v1933_v1 }
 0x112   :  { %1724 = vmatpush3.bf16.msra.mxu1 %v1857_v55  ;;  %v1873_v55 = vld [vmem:[%s2415_s2 + $0x100] sm:$0xff]  }
 0x113   :  { %1725 = vmatprep.subr.bf16.mxu1 %v1933_v1 }
 0x116   :  { %1726 = vmatpush3.bf16.msra.mxu1 %v1858_v56 }
 0x117   :  { %1727 = vmatprep.subr.bf16.mxu1 %v1933_v1 }
 0x11a   :  { %1728 = vmatpush3.bf16.msra.mxu1 %v1859_v5  ;;  %v1896_v5 = vld [vmem:[%s2415_s2 + $0x158] sm:$0xff]  }
 0x11b   :  { %1729 = vmatprep.subr.bf16.mxu1 %v1933_v1 }
 0x11e   :  { %1730 = vmatpush3.bf16.msra.mxu1 %v1860_v6  ;;  %v1897_v6 = vld [vmem:[%s2415_s2 + $0x160] sm:$0xff]  }
 0x11f   :  { %1626 = vmatprep.subr.bf16.mxu1 %v1869_v28  ;;  %v1900_v28 = vld [vmem:[%s2415_s2 + $0x178] sm:$0xff]  }
 0x1d4   :  { %v315_v59 = vpop.f32.mrb[0].mxu1 }
 0x1d5   :  { %v316_v60 = vadd.f32 %v315_v59, %v232_v58  ;;  %v1693_v61 = vpop.f32.mrb[1].mxu1  ;;  %v1879_v59 = vld [vmem:[%s2415_s2 + $0x110] sm:$0xff]  }
 0x1d6   :  { %v318_v62 = vpop.f32.mrb[2].mxu1  ;;  %v1885_v61 = vld [vmem:[%s2415_s2 + $0x120] sm:$0xff]  }
 0x1d7   :  { %v319_v63 = vadd.f32 %v318_v62, %v232_v58  ;;  %v1694_v0 = vpop.f32.mrb[3].mxu1  ;;  %v322_v2 = vmax.f32 %v316_v60, 0.0  ;;  %v1876_v58 = vld [vmem:[%s2415_s2 + $0x108] sm:$0xff]   ;;  %v1882_v60 = vld [vmem:[%s2415_s2 + $0x118] sm:$0xff]  }
 0x1d8   :  { %v1888_v62 = vld [vmem:[%s2415_s2 + $0x128] sm:$0xff]   ;;  %v1891_v0 = vld [vmem:[%s2415_s2 + $0x130] sm:$0xff]  }
 0x1d9   :  { %v323_v3 = vmax.f32 %v319_v63, 0.0  ;;  %v1890_v63 = vld [vmem:[%s2413_s1 + $0xb8] sm:$0xff]  }
 0x1db   :  { %v341_v4 = vpack.c.bf16 %v323_v3, %v322_v2  ;;  %v1892_v2 = vld [vmem:[%s2415_s2 + $0x138] sm:$0xff]   ;;  %v1893_v3 = vld [vmem:[%s2415_s2 + $0x140] sm:$0xff]  }
 0x1dd   :  { %1712 = vmatmul.mubr.bf16.vlgmr.msra.gmra.mrb[4].mxu0 %v341_v4  ;;  %v1895_v4 = vld [vmem:[%s2415_s2 + $0x150] sm:$0xff]  }
 0x1de   :  { %1751 = vmatprep.mubr.msk.bf16.mxu0 %vm1934_vm0, %v1933_v1  ;;  %1736 = vmatpush3.bf16.msra.mxu0 %v1861_v7  ;;  %v570_v7 = vsub.s32 4, %v2093_v34 }
 0x1df   :  { %1737 = vmatprep.subr.bf16.mxu0 %v1933_v1 }
 0x1e2   :  { %1738 = vmatpush3.bf16.msra.mxu0 %v1862_v8  ;;  %v571_v8 = vrot.slane %v2099_v36, %v570_v7 }
 0x1e3   :  { %1739 = vmatprep.subr.bf16.mxu0 %v1933_v1 }
 0x1e6   :  { %1740 = vmatpush3.bf16.msra.mxu0 %v1863_v9 }
 0x1e7   :  { %1741 = vmatprep.subr.bf16.mxu0 %v1933_v1 }
 0x1ea   :  { %1742 = vmatpush3.bf16.msra.mxu0 %v1864_v10 }
 0x1eb   :  { %1743 = vmatprep.subr.bf16.mxu0 %v1933_v1 }
 0x1ee   :  { %1744 = vmatpush3.bf16.msra.mxu0 %v1865_v11 }
 0x1ef   :  { %1745 = vmatprep.subr.bf16.mxu0 %v1933_v1 }
 0x1f2   :  { %1746 = vmatpush3.bf16.msra.mxu0 %v1866_v12 }
 0x1f3   :  { %1747 = vmatprep.subr.bf16.mxu0 %v1933_v1 }
 0x1f6   :  { %1748 = vmatpush3.bf16.msra.mxu0 %v1867_v26  ;;  %v1898_v26 = vld [vmem:[%s2415_s2 + $0x168] sm:$0xff]  }
 0x1f7   :  { %1749 = vmatprep.subr.bf16.mxu0 %v1933_v1 }
 0x1fa   :  { %1750 = vmatpush3.bf16.msra.mxu0 %v1868_v27  ;;  %v1899_v27 = vld [vmem:[%s2415_s2 + $0x170] sm:$0xff]  }
 0x1fb   :  { %1755 = vmatprep.subr.bf16.mxu0 %v1933_v1 }
 0x2b0   :  { %v428_v16 = vpop.f32.mrb[4].mxu0 }
 0x2b1   :  { %v429_v17 = vadd.f32 %v428_v16, %v345_v15  ;;  %v1713_v18 = vpop.f32.mrb[5].mxu0 }
 0x2b2   :  { %v431_v19 = vpop.f32.mrb[6].mxu0 }
 0x2b3   :  { %v432_v20 = vadd.f32 %v431_v19, %v345_v15  ;;  %v1714_v21 = vpop.f32.mrb[7].mxu0  ;;  %v435_v23 = vmax.f32 %v429_v17, 0.0 }
 0x2b5   :  { %v436_v24 = vmax.f32 %v432_v20, 0.0 }
 0x2b7   :  { %v454_v25 = vpack.c.bf16 %v436_v24, %v435_v23 }
 0x2b9   :  { %1732 = vmatmul.mubr.bf16.vlgmr.msra.gmra.mrb[4].mxu1 %v454_v25 }
 0x2ba   :  { %842 = vmatprep.mubr.bf16.mxu1 %v2011_v13  ;;  %v1870_v13 = vld [vmem:[%s2413_s1 + $0x80] sm:$0xff]  }
 0x2bb   :  { %1627 = vmatpush3.bf16.msra.mxu1 %v1870_v13  ;;  %v1901_v13 = vld [vmem:[%s2415_s2 + $0x180] sm:$0xff]  }
 0x2bc   :  { %1628 = vmatprep.subr.bf16.mxu1 %v1871_v29  ;;  %v1902_v29 = vld [vmem:[%s2415_s2 + $0x188] sm:$0xff]  }
 0x2bf   :  { %1629 = vmatpush3.bf16.msra.mxu1 %v1872_v30  ;;  %v1903_v30 = vld [vmem:[%s2415_s2 + $0x190] sm:$0xff]  }
 0x2c0   :  { %1630 = vmatprep.subr.bf16.mxu1 %v1874_v31  ;;  %v1904_v31 = vld [vmem:[%s2415_s2 + $0x198] sm:$0xff]  }
 0x2c3   :  { %1631 = vmatpush3.bf16.msra.mxu1 %v1875_v32  ;;  %v1905_v32 = vld [vmem:[%s2415_s2 + $0x1a0] sm:$0xff]  }
 0x2c4   :  { %1632 = vmatprep.subr.bf16.mxu1 %v1877_v33  ;;  %v1906_v33 = vld [vmem:[%s2415_s2 + $0x1a8] sm:$0xff]  }
 0x2c7   :  { %1633 = vmatpush3.bf16.msra.mxu1 %v1878_v37  ;;  %v942_v37 = vsub.s32 5, %v2093_v34 }
 0x2c8   :  { %1634 = vmatprep.subr.bf16.mxu1 %v1880_v38 }
 0x2c9   :  { %v943_v38 = vrot.slane %v2099_v36, %v942_v37 }
 0x2cb   :  { %1635 = vmatpush3.bf16.msra.mxu1 %v1881_v39 }
 0x2cc   :  { %1636 = vmatprep.subr.bf16.mxu1 %v1883_v40 }
 0x2cf   :  { %1637 = vmatpush3.bf16.msra.mxu1 %v1884_v41 }
 0x2d0   :  { %1638 = vmatprep.subr.bf16.mxu1 %v1886_v42 }
 0x2d3   :  { %1639 = vmatpush3.bf16.msra.mxu1 %v1887_v43 }
 0x2d4   :  { %1640 = vmatprep.subr.bf16.mxu1 %v1889_v44 }
 0x2d7   :  { %1641 = vmatpush3.bf16.msra.mxu1 %v1890_v63  ;;  %v1924_v63 = vld [vmem:[%s2417_s4 + $0x50] ss:$8 sps:$4 sm:$0xff]  }
 0x2d8   :  { %1775 = vmatprep.subr.bf16.mxu1 %v1933_v1 }
 0x2da   :  { %843 = vmatmul.mubr.bf16.vlgmr.msra.gmra.mrb[8].mxu1 %v2043_v22  ;;  %v1894_v22 = vld [vmem:[%s2415_s2 + $0x148] sm:$0xff]  }
 0x2db   :  { %1791 = vmatprep.mubr.msk.bf16.mxu1 %vm1934_vm0, %v1933_v1  ;;  %1776 = vmatpush3.bf16.msra.mxu1 %v1893_v3 }
 0x2dc   :  { %1777 = vmatprep.subr.bf16.mxu1 %v1933_v1 }
 0x2df   :  { %1778 = vmatpush3.bf16.msra.mxu1 %v1894_v22 }
 0x2e0   :  { %1779 = vmatprep.subr.bf16.mxu1 %v1933_v1 }
 0x2e3   :  { %1780 = vmatpush3.bf16.msra.mxu1 %v1895_v4 }
 0x2e4   :  { %1781 = vmatprep.subr.bf16.mxu1 %v1933_v1 }
 0x2e7   :  { %1782 = vmatpush3.bf16.msra.mxu1 %v1896_v5 }
 0x2e8   :  { %1783 = vmatprep.subr.bf16.mxu1 %v1933_v1 }
 0x2eb   :  { %1784 = vmatpush3.bf16.msra.mxu1 %v1897_v6 }
 0x2ec   :  { %1785 = vmatprep.subr.bf16.mxu1 %v1933_v1 }
 0x2ef   :  { %1786 = vmatpush3.bf16.msra.mxu1 %v1898_v26 }
 0x2f0   :  { %1787 = vmatprep.subr.bf16.mxu1 %v1933_v1 }
 0x2f3   :  { %1788 = vmatpush3.bf16.msra.mxu1 %v1899_v27 }
 0x2f4   :  { %1789 = vmatprep.subr.bf16.mxu1 %v1933_v1 }
 0x2f7   :  { %1790 = vmatpush3.bf16.msra.mxu1 %v1900_v28 }
 0x38c   :  { %v541_v47 = vpop.f32.mrb[4].mxu1 }
 0x38d   :  { %v542_v48 = vadd.f32 %v541_v47, %v458_v46  ;;  %v1733_v49 = vpop.f32.mrb[5].mxu1 }
 0x38e   :  { %v544_v50 = vpop.f32.mrb[6].mxu1 }
 0x38f   :  { %v545_v51 = vadd.f32 %v544_v50, %v458_v46  ;;  %v1734_v52 = vpop.f32.mrb[7].mxu1  ;;  %v548_v53 = vmax.f32 %v542_v48, 0.0  ;;  %v1907_v50 = vld [vmem:[%s2415_s2 + $0x1b0] sm:$0xff]  }
 0x390   :  { %v1909_v52 = vld [vmem:[%s2417_s4] ss:$8 sps:$4 sm:$0xff]  }
 0x391   :  { %v549_v54 = vmax.f32 %v545_v51, 0.0  ;;  %v1908_v51 = vld [vmem:[%s2415_s2 + $0x1b8] sm:$0xff]  }
 0x393   :  { %v567_v56 = vpack.c.bf16 %v549_v54, %v548_v53  ;;  %v1911_v53 = vld [vmem:[%s2417_s4 + $0x4] ss:$8 sps:$4 sm:$0xff]   ;;  %v1914_v54 = vld [vmem:[%s2417_s4 + $0x14] ss:$8 sps:$4 sm:$0xff]  }
 0x394   :  { %1283 = vmatprep.subr.bf16.mxu1 %v1911_v53 }
 0x395   :  { %1752 = vmatmul.mubr.bf16.vlgmr.msra.gmra.mrb[8].mxu0 %v567_v56  ;;  %v1915_v56 = vld [vmem:[%s2417_s4 + $0x20] ss:$8 sps:$4 sm:$0xff]  }
 0x396   :  { %1756 = vmatpush3.bf16.msra.mxu0 %v1873_v55  ;;  %1771 = vmatprep.mubr.msk.bf16.mxu0 %vm1934_vm0, %v1933_v1  ;;  %v1917_v55 = vld [vmem:[%s2417_s4 + $0x24] ss:$8 sps:$4 sm:$0xff]  }
 0x397   :  { %1757 = vmatprep.subr.bf16.mxu0 %v1933_v1 }
 0x39a   :  { %1758 = vmatpush3.bf16.msra.mxu0 %v1876_v58  ;;  %v1920_v58 = vld [vmem:[%s2417_s4 + $0x34] ss:$8 sps:$4 sm:$0xff]  }
 0x39b   :  { %1759 = vmatprep.subr.bf16.mxu0 %v1933_v1 }
 0x39e   :  { %1760 = vmatpush3.bf16.msra.mxu0 %v1879_v59  ;;  %v1918_v59 = vld [vmem:[%s2417_s4 + $0x30] ss:$8 sps:$4 sm:$0xff]  }
 0x39f   :  { %1761 = vmatprep.subr.bf16.mxu0 %v1933_v1 }
 0x3a2   :  { %1762 = vmatpush3.bf16.msra.mxu0 %v1882_v60  ;;  %v1923_v60 = vld [vmem:[%s2417_s4 + $0x44] ss:$8 sps:$4 sm:$0xff]  }
 0x3a3   :  { %1763 = vmatprep.subr.bf16.mxu0 %v1933_v1 }
 0x3a6   :  { %1764 = vmatpush3.bf16.msra.mxu0 %v1885_v61  ;;  %v1921_v61 = vld [vmem:[%s2417_s4 + $0x40] ss:$8 sps:$4 sm:$0xff]  }
 0x3a7   :  { %1765 = vmatprep.subr.bf16.mxu0 %v1933_v1 }
 0x3aa   :  { %1766 = vmatpush3.bf16.msra.mxu0 %v1888_v62  ;;  %v1926_v62 = vld [vmem:[%s2417_s4 + $0x54] ss:$8 sps:$4 sm:$0xff]  }
 0x3ab   :  { %1767 = vmatprep.subr.bf16.mxu0 %v1933_v1 }
 0x3ad   :  { %v1642_v19 = vpop.f32.mrb[8].mxu1 }
 0x3ae   :  { %1768 = vmatpush3.bf16.msra.mxu0 %v1891_v0  ;;  %v1643_v20 = vpop.f32.mrb[9].mxu1  ;;  %v968_v0 = vsub.s32 6, %v2093_v34 }
 0x3af   :  { %1769 = vmatprep.subr.bf16.mxu0 %v1933_v1  ;;  %v1644_v21 = vadd.f32 %v1643_v20, %v1642_v19  ;;  %v1645_v23 = vpop.f32.mrb[10].mxu1 }
 0x3b0   :  { %v1646_v24 = vpop.f32.mrb[11].mxu1 }
 0x3b1   :  { %v1647_v25 = vadd.f32 %v1646_v24, %v1645_v23 }
 0x3b2   :  { %1770 = vmatpush3.bf16.msra.mxu0 %v1892_v2  ;;  %v969_v2 = vrot.slane %v2099_v36, %v968_v0 }
 0x3b3   :  { %1795 = vmatprep.subr.bf16.mxu0 %v1933_v1 }
 0x468   :  { %v654_v9 = vpop.f32.mrb[8].mxu0 }
 0x469   :  { %v655_v10 = vadd.f32 %v654_v9, %v571_v8  ;;  %v1753_v11 = vpop.f32.mrb[9].mxu0 }
 0x46a   :  { %v657_v12 = vpop.f32.mrb[10].mxu0  ;;  %v1929_v11 = vld [vmem:[%s2417_s4 + $0x64] ss:$8 sps:$4 sm:$0xff]  }
 0x46b   :  { %v658_v14 = vadd.f32 %v657_v12, %v571_v8  ;;  %v1754_v15 = vpop.f32.mrb[11].mxu0  ;;  %v661_v16 = vmax.f32 %v655_v10, 0.0  ;;  %v1927_v12 = vld [vmem:[%s2417_s4 + $0x60] ss:$8 sps:$4 sm:$0xff]  }
 0x46c   :  { %v1930_v15 = vld [vmem:[%s2417_s4 + $0x70] ss:$8 sps:$4 sm:$0xff]  }
 0x46d   :  { %v662_v17 = vmax.f32 %v658_v14, 0.0  ;;  %v1932_v14 = vld [vmem:[%s2417_s4 + $0x74] ss:$8 sps:$4 sm:$0xff]  }
 0x46f   :  { %v680_v18 = vpack.c.bf16 %v662_v17, %v661_v16  ;;  %v1935_v16 = vmov 0   ;;  %v1081_v17 = vsub.s32 7, %v2093_v34 }
 0x471   :  { %1772 = vmatmul.mubr.bf16.vlgmr.msra.gmra.mrb[12].mxu0 %v680_v18  ;;  %v1082_v18 = vrot.slane %v2099_v36, %v1081_v17 }
 0x472   :  { %1811 = vmatprep.mubr.msk.bf16.mxu0 %vm1934_vm0, %v1933_v1  ;;  %1796 = vmatpush3.bf16.msra.mxu0 %v1901_v13  ;;  %v1191_v13 = vld [vmem:[%s2418_s5] sm:$0x3] }
 0x473   :  { %1797 = vmatprep.subr.bf16.mxu0 %v1933_v1  ;;  %v1200_v36 = vrot.slane %v1191_v13, %v231_v57 }
 0x476   :  { %1798 = vmatpush3.bf16.msra.mxu0 %v1902_v29  ;;  %v1196_v29 = vrot.slane %v1191_v13, %v61_v35 }
 0x477   :  { %1799 = vmatprep.subr.bf16.mxu0 %v1933_v1 }
 0x47a   :  { %1800 = vmatpush3.bf16.msra.mxu0 %v1903_v30 }
 0x47b   :  { %1801 = vmatprep.subr.bf16.mxu0 %v1933_v1 }
 0x47e   :  { %1802 = vmatpush3.bf16.msra.mxu0 %v1904_v31 }
 0x47f   :  { %1803 = vmatprep.subr.bf16.mxu0 %v1933_v1 }
 0x482   :  { %1804 = vmatpush3.bf16.msra.mxu0 %v1905_v32 }
 0x483   :  { %1805 = vmatprep.subr.bf16.mxu0 %v1933_v1 }
 0x486   :  { %1806 = vmatpush3.bf16.msra.mxu0 %v1906_v33 }
 0x487   :  { %1807 = vmatprep.subr.bf16.mxu0 %v1933_v1 }
 0x48a   :  { %1808 = vmatpush3.bf16.msra.mxu0 %v1907_v50 }
 0x48b   :  { %1809 = vmatprep.subr.bf16.mxu0 %v1933_v1  ;;  %v1912_v1 = vld [vmem:[%s2417_s4 + $0x10] ss:$8 sps:$4 sm:$0xff]  }
 0x48e   :  { %1810 = vmatpush3.bf16.msra.mxu0 %v1908_v51 }
 0x544   :  { %v933_v39 = vpop.f32.mrb[12].mxu0 }
 0x545   :  { %v934_v40 = vadd.f32 %v1644_v21, %v933_v39  ;;  %v1773_v41 = vpop.f32.mrb[13].mxu0 }
 0x546   :  { %v936_v42 = vpop.f32.mrb[14].mxu0 }
 0x547   :  { %v944_v43 = vadd.f32 %v943_v38, %v934_v40  ;;  %v937_v44 = vadd.f32 %v1647_v25, %v936_v42  ;;  %v1774_v45 = vpop.f32.mrb[15].mxu0 }
 0x549   :  { %v945_v46 = vadd.f32 %v943_v38, %v937_v44  ;;  %v946_v47 = vmax.f32 %v944_v43, 0.0 }
 0x54b   :  { %v947_v48 = vmax.f32 %v945_v46, 0.0 }
 0x54d   :  { %v965_v49 = vpack.c.bf16 %v947_v48, %v946_v47 }
 0x54f   :  { %1792 = vmatmul.mubr.bf16.vlgmr.msra.gmra.mrb[12].mxu1 %v965_v49 }
 0x550   :  { %1284 = vmatpush1.bf16.msra.mxu1 %v1909_v52  ;;  %1315 = vmatprep.mubr.bf16.mxu1 %v1935_v16 }
 0x551   :  { %1285 = vmatprep.subr.bf16.mxu1 %v1914_v54 }
 0x554   :  { %1286 = vmatpush1.bf16.msra.mxu1 %v1912_v1 }
 0x555   :  { %1287 = vmatprep.subr.bf16.mxu1 %v1917_v55 }
 0x558   :  { %1288 = vmatpush1.bf16.msra.mxu1 %v1915_v56 }
 0x559   :  { %1289 = vmatprep.subr.bf16.mxu1 %v1920_v58 }
 0x55c   :  { %1290 = vmatpush1.bf16.msra.mxu1 %v1918_v59 }
 0x55d   :  { %1291 = vmatprep.subr.bf16.mxu1 %v1923_v60 }
 0x560   :  { %1292 = vmatpush1.bf16.msra.mxu1 %v1921_v61 }
 0x561   :  { %1293 = vmatprep.subr.bf16.mxu1 %v1926_v62 }
 0x564   :  { %1294 = vmatpush1.bf16.msra.mxu1 %v1924_v63 }
 0x565   :  { %1295 = vmatprep.subr.bf16.mxu1 %v1929_v11 }
 0x568   :  { %1296 = vmatpush1.bf16.msra.mxu1 %v1927_v12 }
 0x569   :  { %1297 = vmatprep.subr.bf16.mxu1 %v1932_v14 }
 0x56c   :  { %1298 = vmatpush1.bf16.msra.mxu1 %v1930_v15 }
 0x622   :  { %v1052_v3 = vpop.f32.mrb[12].mxu1 }
 0x623   :  { %v1053_v22 = vadd.f32 %v1052_v3, %v969_v2  ;;  %v1793_v4 = vpop.f32.mrb[13].mxu1 }
 0x624   :  { %v1055_v5 = vpop.f32.mrb[14].mxu1 }
 0x625   :  { %v1056_v6 = vadd.f32 %v1055_v5, %v969_v2  ;;  %v1794_v7 = vpop.f32.mrb[15].mxu1  ;;  %v1059_v8 = vmax.f32 %v1053_v22, 0.0 }
 0x627   :  { %v1060_v9 = vmax.f32 %v1056_v6, 0.0 }
 0x629   :  { %v1078_v10 = vpack.c.bf16 %v1060_v9, %v1059_v8 }
 0x62b   :  { %1812 = vmatmul.mubr.bf16.vlgmr.msra.gmra.mrb[16].mxu0 %v1078_v10 }
 0x6fe   :  { %v1165_v19 = vpop.f32.mrb[16].mxu0 }
 0x6ff   :  { %v1166_v20 = vadd.f32 %v1165_v19, %v1082_v18  ;;  %v1813_v21 = vpop.f32.mrb[17].mxu0 }
 0x700   :  { %v1168_v23 = vpop.f32.mrb[18].mxu0 }
 0x701   :  { %v1169_v24 = vadd.f32 %v1168_v23, %v1082_v18  ;;  %v1814_v25 = vpop.f32.mrb[19].mxu0  ;;  %v1172_v26 = vmax.f32 %v1166_v20, 0.0 }
 0x703   :  { %v1173_v27 = vmax.f32 %v1169_v24, 0.0 }
 0x705   :  { %v1190_v28 = vpack.c.bf16 %v1173_v27, %v1172_v26 }
 0x707   :  { %1316 = vmatmul.mubr.bf16.vlgmr.msra.gmra.mrb[16].mxu1 %v1190_v28 }
 0x7da   :  { %v1317_v30 = vpop.f32.mrb[16].mxu1 }
 0x7db   :  { %v1318_v31 = vadd.f32 %v1317_v30, %v1196_v29  ;;  %v1319_v32 = vpop.f32.mrb[17].mxu1 }
 0x7dc   :  { %v1320_v33 = vadd.f32 %v1319_v32, %v1200_v36  ;;  %v1321_v37 = vpop.f32.mrb[18].mxu1 }
 0x7dd   :  { %1326 = vst [vmem:[%s2419_s6] sm:$0xff] %v1318_v31  ;;  %v1322_v38 = vadd.f32 %v1321_v37, %v1196_v29  ;;  %v1323_v39 = vpop.f32.mrb[19].mxu1 }
 0x7de   :  { %1327 = vst [vmem:[%s2419_s6 + $0x8] sm:$0xff] %v1320_v33  ;;  %v1324_v40 = vadd.f32 %v1323_v39, %v1200_v36 }
 0x7df   :  { %1328 = vst [vmem:[%s2419_s6 + $0x10] sm:$0xff] %v1322_v38 }
 0x7e0   :  { %1329 = vst [vmem:[%s2419_s6 + $0x18] sm:$0xff] %v1324_v40 }

</bundles_post_ra>
